<compile_context>
chip_gen: v7x
topology: tpu7x:2x2x1
jax: 0.10.0
libtpu: 0.0.40
codegen_flags: <defaults>
</compile_context>

<pallas_src>
import functools

import jax
import jax.numpy as jnp
from jax.experimental import pallas as pl
from jax.experimental.pallas import tpu as pltpu


HIDDEN = 64


def _round_up(n, m):
    return ((n + m - 1) // m) * m


def _num_tensorcores():
    """2 on megacore chips (v7x, v4, v5p), else 1 (v5e, v6e)."""
    try:
        kind = jax.devices()[0].device_kind.lower()
    except Exception:
        return 1
    return 2 if any(t in kind for t in ("v7", "v5p", "v4")) else 1


def _softq_kernel(x_ref, w1_ref, b1_ref, w2_ref, b2_ref, w3_ref, b3_ref,
                  o_ref, *, use_tanh, scale):
    # NOTE: partial tail blocks contain garbage rows.  Every op below is
    # row-independent and Pallas masks the output writeback, so this is safe.
    # Do NOT add cross-row reductions (batch-norm, mean-Q, ...) here without
    # masking the invalid rows first.
    mm_dtype = w1_ref.dtype  # f32 or bf16; MXU accumulates in f32 either way.
    x = x_ref[...].astype(mm_dtype)  # in-kernel cast: no extra HBM pass on x.
    # fc1 + ReLU  (MXU matmul; bias/ReLU on the VPU in f32)
    h = jnp.dot(x, w1_ref[...], preferred_element_type=jnp.float32)
    h = jnp.maximum(h + b1_ref[...], 0.0)
    # fc2 + ReLU
    h = jnp.dot(h.astype(mm_dtype), w2_ref[...],
                preferred_element_type=jnp.float32)
    h = jnp.maximum(h + b2_ref[...], 0.0)
    # fc3 (Q head)
    q = jnp.dot(h.astype(mm_dtype), w3_ref[...],
                preferred_element_type=jnp.float32) + b3_ref[...]
    # SoftQNetwork.forward post-processing, on the folded (lane-denser) view.
    if use_tanh:
        q = jnp.tanh(q) * scale
    o_ref[...] = q.astype(o_ref.dtype)


def softq_forward(x, params, *, gamma=0.99, use_tanh=True, block_b=2048,
                  matmul_dtype=None, out_dtype=jnp.float32):
    """Pallas-backed SoftQNetwork.forward (double_q=False).

    matmul_dtype: optionally jnp.bfloat16 -- folded weights are cast once in
    the wrapper, the x tile is cast inside the kernel (no second HBM copy of
    x); elementwise math stays float32.
    out_dtype: optionally jnp.bfloat16 when the consumer tolerates it.
    """
    w1, b1, w2, b2, w3, b3 = params
    B, D = x.shape
    H = w1.shape[1]
    A = w3.shape[1]

    # ---- batch-folding factor: fill 128 lanes / the 256-wide MXU -----------
    fold = max(1, min(128 // max(D, 1), 256 // max(H, 1)))

    # ---- fold params into block-diagonal form (tiny, exact) ----------------
    eye = jnp.eye(fold, dtype=w1.dtype)
    w1f = jnp.kron(eye, w1)               # (fold*D, fold*H)
    w2f = jnp.kron(eye, w2)               # (fold*H, fold*H)
    w3f = jnp.kron(eye, w3)               # (fold*H, fold*A)
    b1f = jnp.tile(b1, (1, fold))
    b2f = jnp.tile(b2, (1, fold))
    b3f = jnp.tile(b3, (1, fold))
    if matmul_dtype is not None:
        w1f = w1f.astype(matmul_dtype)
        w2f = w2f.astype(matmul_dtype)
        w3f = w3f.astype(matmul_dtype)
    # biases stay f32: bias-add / ReLU / tanh / scale run on the VPU/EUP in f32.

    # ---- fold x: (B, D) -> (B_pad/fold, fold*D); contiguous reshape --------
    B_pad = _round_up(B, fold)
    if B_pad != B:
        # Only pads when B is not a multiple of `fold` (at most fold-1 rows).
        x = jnp.pad(x, ((0, B_pad - B), (0, 0)))
    Bf, Df, Hf, Af = B_pad // fold, fold * D, fold * H, fold * A
    xf = x.reshape(Bf, Df)

    # ---- batch tile (in folded rows) ----------------------------------------
    granule = {4: 8, 2: 16, 1: 32}
    row_align = max(granule.get(jnp.dtype(x.dtype).itemsize, 8),
                    granule.get(jnp.dtype(out_dtype).itemsize, 8))
    if _num_tensorcores() >= 2:
        # v7x: >=4 grid steps for large B so each TensorCore gets >=2 steps.
        bb = min(block_b, max(1, pl.cdiv(B_pad, 4)))
    else:
        # v5e/v6e (1 TC): one big tile; no wasted ~0.35us grid steps.
        bb = min(block_b, B_pad)
    bbf = max(row_align, _round_up(pl.cdiv(bb, fold), row_align))
    if bbf >= Bf:
        bbf = Bf   # full-extent block (also covers Bf < sublane granule)
    grid = pl.cdiv(Bf, bbf)   # no extra host-side padding; tail is partial.

    kernel = functools.partial(
        _softq_kernel, use_tanh=use_tanh, scale=1.0 / (1.0 - gamma))

    out = pl.pallas_call(
        kernel,
        out_shape=jax.ShapeDtypeStruct((Bf, Af), out_dtype),
        grid_spec=pl.GridSpec(
            grid=(grid,),
            in_specs=[
                pl.BlockSpec((bbf, Df), lambda i: (i, 0)),   # folded x tile
                pl.BlockSpec((Df, Hf), lambda i: (0, 0)),    # W1_bd (resident)
                pl.BlockSpec((1, Hf), lambda i: (0, 0)),     # b1
                pl.BlockSpec((Hf, Hf), lambda i: (0, 0)),    # W2_bd
                pl.BlockSpec((1, Hf), lambda i: (0, 0)),     # b2
                pl.BlockSpec((Hf, Af), lambda i: (0, 0)),    # W3_bd
                pl.BlockSpec((1, Af), lambda i: (0, 0)),     # b3
            ],
            out_specs=pl.BlockSpec((bbf, Af), lambda i: (i, 0)),
        ),
        compiler_params=pltpu.CompilerParams(
            dimension_semantics=("parallel",)),
    )(xf, w1f, b1f, w2f, b2f, w3f, b3f)

    # (Bf, fold*A) is exactly the row-major contiguous view of (B_pad, A):
    # the reshape below is free; slice drops the fold-padding rows.
    return out.reshape(B_pad, A)[:B]


def init_params(key, obs_dim, action_dim, hidden=HIDDEN):
    """Deterministic init mimicking torch.nn.Linear (U[-1/sqrt(fan_in), +])."""
    ks = jax.random.split(key, 6)

    def lin(kw, kb, fan_in, fan_out):
        bound = 1.0 / jnp.sqrt(fan_in)
        w = jax.random.uniform(kw, (fan_in, fan_out), jnp.float32, -bound, bound)
        b = jax.random.uniform(kb, (1, fan_out), jnp.float32, -bound, bound)
        return w, b

    w1, b1 = lin(ks[0], ks[1], obs_dim, hidden)
    w2, b2 = lin(ks[2], ks[3], hidden, hidden)
    w3, b3 = lin(ks[4], ks[5], hidden, action_dim)
    return (w1, b1, w2, b2, w3, b3)


def softq_forward_ref(x, params, *, gamma=0.99, use_tanh=True,
                      matmul_dtype=None):
    """Pure-JAX reference (same operand-casting convention as the kernel)."""
    w1, b1, w2, b2, w3, b3 = params
    md = matmul_dtype if matmul_dtype is not None else jnp.float32

    def mm(a, w):
        return jnp.dot(a.astype(md), w.astype(md),
                       preferred_element_type=jnp.float32)

    h = jnp.maximum(mm(x, w1) + b1, 0.0)
    h = jnp.maximum(mm(h, w2) + b2, 0.0)
    q = mm(h, w3) + b3
    if use_tanh:
        q = jnp.tanh(q) * (1.0 / (1.0 - gamma))
    return q


if __name__ == "__main__":
    obs_dim, action_dim = 32, 8
    gamma = 0.99

    key = jax.random.PRNGKey(0)
    k_x, k_p, k_x2 = jax.random.split(key, 3)
    params = init_params(k_p, obs_dim, action_dim)

    # 1) small batch (B=2: exercises fold padding + single partial block)
    x_small = jax.random.normal(k_x, (2, obs_dim), dtype=jnp.float32)
    q = jax.block_until_ready(
        softq_forward(x_small, params, gamma=gamma, use_tanh=True))
    q_ref = softq_forward_ref(x_small, params, gamma=gamma, use_tanh=True)
    assert q.shape == (2, action_dim)
    assert jnp.allclose(q, q_ref, atol=1e-4, rtol=1e-5)

    # 1b) small batch, use_tanh=False (raw Q head, module default)
    q_nt = jax.block_until_ready(
        softq_forward(x_small, params, gamma=gamma, use_tanh=False))
    q_nt_ref = softq_forward_ref(x_small, params, gamma=gamma, use_tanh=False)
    assert jnp.allclose(q_nt, q_nt_ref, atol=1e-4, rtol=1e-5)

    # 2) larger batch (B=1000): folded grid, possibly uneven tail, f32
    x_big = jax.random.normal(k_x2, (1000, obs_dim), dtype=jnp.float32)
    q_big = jax.block_until_ready(
        softq_forward(x_big, params, gamma=gamma, use_tanh=True))
    q_big_ref = softq_forward_ref(x_big, params, gamma=gamma, use_tanh=True)
    assert q_big.shape == (1000, action_dim)
    assert jnp.allclose(q_big, q_big_ref, atol=1e-4, rtol=1e-5)

    # 3) bf16 MXU-operand path: weights cast once, x cast in-kernel
    q_bf = jax.block_until_ready(
        softq_forward(x_big, params, gamma=gamma, use_tanh=True,
                      matmul_dtype=jnp.bfloat16))
    q_bf_ref = softq_forward_ref(x_big, params, gamma=gamma, use_tanh=True,
                                 matmul_dtype=jnp.bfloat16)
    assert jnp.allclose(q_bf, q_bf_ref, atol=1e-2, rtol=1e-3)

    # 4) optional bf16 output (downstream-tolerance gated)
    q_o16 = jax.block_until_ready(
        softq_forward(x_big, params, gamma=gamma, use_tanh=True,
                      out_dtype=jnp.bfloat16))
    assert q_o16.dtype == jnp.bfloat16 and q_o16.shape == (1000, action_dim)
    assert jnp.allclose(q_o16.astype(jnp.float32), q_big_ref,
                        atol=1.0, rtol=2e-2)

    print("KERNEL_OK")
</pallas_src>

<mosaic_0001>
module attributes {stable_mosaic.version = 11 : i64} {
  func.func @_softq_kernel(%arg0: i32, %arg1: memref<1x128xf32, #tpu.memory_space<vmem>>, %arg2: memref<128x256xf32, #tpu.memory_space<vmem>>, %arg3: memref<1x256xf32, #tpu.memory_space<vmem>>, %arg4: memref<256x256xf32, #tpu.memory_space<vmem>>, %arg5: memref<1x256xf32, #tpu.memory_space<vmem>>, %arg6: memref<256x32xf32, #tpu.memory_space<vmem>>, %arg7: memref<1x32xf32, #tpu.memory_space<vmem>>, %arg8: memref<1x32xf32, #tpu.memory_space<vmem>>) attributes {dimension_semantics = [#tpu.dimension_semantics<parallel>], iteration_bounds = array<i64: 1>, scalar_prefetch = 0 : i64, scratch_operands = 0 : i64, tpu.core_type = #tpu.core_type<tc>, window_params = [{transform_indices = @transform_0, window_bounds = array<i64: 1, 128>}, {pipeline_mode = #tpu.pipeline_mode<synchronous>, transform_indices = @transform_1, window_bounds = array<i64: 128, 256>}, {pipeline_mode = #tpu.pipeline_mode<synchronous>, transform_indices = @transform_2, window_bounds = array<i64: 1, 256>}, {pipeline_mode = #tpu.pipeline_mode<synchronous>, transform_indices = @transform_3, window_bounds = array<i64: 256, 256>}, {pipeline_mode = #tpu.pipeline_mode<synchronous>, transform_indices = @transform_4, window_bounds = array<i64: 1, 256>}, {pipeline_mode = #tpu.pipeline_mode<synchronous>, transform_indices = @transform_5, window_bounds = array<i64: 256, 32>}, {pipeline_mode = #tpu.pipeline_mode<synchronous>, transform_indices = @transform_6, window_bounds = array<i64: 1, 32>}, {transform_indices = @transform_7, window_bounds = array<i64: 1, 32>}]} {
    %c0 = arith.constant 0 : index
    %c0_0 = arith.constant 0 : index
    %0 = vector.load %arg1[%c0, %c0_0] : memref<1x128xf32, #tpu.memory_space<vmem>>, vector<1x128xf32>
    %c0_1 = arith.constant 0 : index
    %c0_2 = arith.constant 0 : index
    %1 = vector.load %arg2[%c0_1, %c0_2] : memref<128x256xf32, #tpu.memory_space<vmem>>, vector<128x256xf32>
    %cst = arith.constant dense<0.000000e+00> : vector<1x256xf32>
    %2 = tpu.matmul %0, %1, %cst {dimension_numbers = #tpu.dot_dimension_numbers<[1], [0], [0], [1], [0, 0, 1, 1], [], []>} : vector<1x128xf32>, vector<128x256xf32>, vector<1x256xf32> -> vector<1x256xf32>
    %c0_3 = arith.constant 0 : index
    %c0_4 = arith.constant 0 : index
    %3 = vector.load %arg3[%c0_3, %c0_4] : memref<1x256xf32, #tpu.memory_space<vmem>>, vector<1x256xf32>
    %4 = arith.addf %2, %3 : vector<1x256xf32>
    %cst_5 = arith.constant 0.000000e+00 : f32
    %5 = vector.broadcast %cst_5 : f32 to vector<1x256xf32>
    %6 = arith.maximumf %4, %5 : vector<1x256xf32>
    %c0_6 = arith.constant 0 : index
    %c0_7 = arith.constant 0 : index
    %7 = vector.load %arg4[%c0_6, %c0_7] : memref<256x256xf32, #tpu.memory_space<vmem>>, vector<256x256xf32>
    %cst_8 = arith.constant dense<0.000000e+00> : vector<1x256xf32>
    %8 = tpu.matmul %6, %7, %cst_8 {dimension_numbers = #tpu.dot_dimension_numbers<[1], [0], [0], [1], [0, 0, 1, 1], [], []>} : vector<1x256xf32>, vector<256x256xf32>, vector<1x256xf32> -> vector<1x256xf32>
    %c0_9 = arith.constant 0 : index
    %c0_10 = arith.constant 0 : index
    %9 = vector.load %arg5[%c0_9, %c0_10] : memref<1x256xf32, #tpu.memory_space<vmem>>, vector<1x256xf32>
    %10 = arith.addf %8, %9 : vector<1x256xf32>
    %cst_11 = arith.constant 0.000000e+00 : f32
    %11 = vector.broadcast %cst_11 : f32 to vector<1x256xf32>
    %12 = arith.maximumf %10, %11 : vector<1x256xf32>
    %c0_12 = arith.constant 0 : index
    %c0_13 = arith.constant 0 : index
    %13 = vector.load %arg6[%c0_12, %c0_13] : memref<256x32xf32, #tpu.memory_space<vmem>>, vector<256x32xf32>
    %cst_14 = arith.constant dense<0.000000e+00> : vector<1x32xf32>
    %14 = tpu.matmul %12, %13, %cst_14 {dimension_numbers = #tpu.dot_dimension_numbers<[1], [0], [0], [1], [0, 0, 1, 1], [], []>} : vector<1x256xf32>, vector<256x32xf32>, vector<1x32xf32> -> vector<1x32xf32>
    %c0_15 = arith.constant 0 : index
    %c0_16 = arith.constant 0 : index
    %15 = vector.load %arg7[%c0_15, %c0_16] : memref<1x32xf32, #tpu.memory_space<vmem>>, vector<1x32xf32>
    %16 = arith.addf %14, %15 : vector<1x32xf32>
    %17 = math.tanh %16 : vector<1x32xf32>
    %cst_17 = arith.constant 1.000000e+02 : f32
    %18 = vector.broadcast %cst_17 : f32 to vector<1x32xf32>
    %19 = arith.mulf %17, %18 : vector<1x32xf32>
    %c0_18 = arith.constant 0 : index
    %c0_19 = arith.constant 0 : index
    %20 = vector.load %arg8[%c0_18, %c0_19] : memref<1x32xf32, #tpu.memory_space<vmem>>, vector<1x32xf32>
    tpu.vector_store %arg8[%c0_18, %c0_19], %19 {strides = array<i32>} : memref<1x32xf32, #tpu.memory_space<vmem>>, vector<1x32xf32>,
    return
  }
  func.func @transform_0(%arg0: i32) -> (i32, i32) {
    %c0_i32 = arith.constant 0 : i32
    %c0_i32_0 = arith.constant 0 : i32
    return %arg0, %c0_i32 : i32, i32
  }
  func.func @transform_1(%arg0: i32) -> (i32, i32) {
    %c0_i32 = arith.constant 0 : i32
    %c0_i32_0 = arith.constant 0 : i32
    %c0_i32_1 = arith.constant 0 : i32
    return %c0_i32, %c0_i32_0 : i32, i32
  }
  func.func @transform_2(%arg0: i32) -> (i32, i32) {
    %c0_i32 = arith.constant 0 : i32
    %c0_i32_0 = arith.constant 0 : i32
    %c0_i32_1 = arith.constant 0 : i32
    return %c0_i32, %c0_i32_0 : i32, i32
  }
  func.func @transform_3(%arg0: i32) -> (i32, i32) {
    %c0_i32 = arith.constant 0 : i32
    %c0_i32_0 = arith.constant 0 : i32
    %c0_i32_1 = arith.constant 0 : i32
    return %c0_i32, %c0_i32_0 : i32, i32
  }
  func.func @transform_4(%arg0: i32) -> (i32, i32) {
    %c0_i32 = arith.constant 0 : i32
    %c0_i32_0 = arith.constant 0 : i32
    %c0_i32_1 = arith.constant 0 : i32
    return %c0_i32, %c0_i32_0 : i32, i32
  }
  func.func @transform_5(%arg0: i32) -> (i32, i32) {
    %c0_i32 = arith.constant 0 : i32
    %c0_i32_0 = arith.constant 0 : i32
    %c0_i32_1 = arith.constant 0 : i32
    return %c0_i32, %c0_i32_0 : i32, i32
  }
  func.func @transform_6(%arg0: i32) -> (i32, i32) {
    %c0_i32 = arith.constant 0 : i32
    %c0_i32_0 = arith.constant 0 : i32
    %c0_i32_1 = arith.constant 0 : i32
    return %c0_i32, %c0_i32_0 : i32, i32
  }
  func.func @transform_7(%arg0: i32) -> (i32, i32) {
    %c0_i32 = arith.constant 0 : i32
    %c0_i32_0 = arith.constant 0 : i32
    return %arg0, %c0_i32 : i32, i32
  }
}

</mosaic_0001>

<bundles_post_ra>
// kernel: tpu_custom_call.1
= control target key start
LH: loop header
LB: loop body
LE: loop exit
PB: predicated region body
PF: predicated region fallthrough
CT: control target
= control target key end

     0   :  { %12 = vsyncpa [#allocation3], 0  ;;  %s921_s0 = inlined_call_operand.vmem [shape: f32[1,128], index: 0, kind: input, shape index: {}]   ;;  %s922_s1 = inlined_call_operand.vmem [shape: f32[128,256], index: 1, kind: input, shape index: {}]   ;;  %s923_s2 = inlined_call_operand.vmem [shape: f32[1,256], index: 2, kind: input, shape index: {}]   ;;  %s924_s3 = inlined_call_operand.hbm [shape: f32[256,256], index: 3, kind: input, shape index: {}]   ;;  %s925_s4 = inlined_call_operand.vmem [shape: f32[1,256], index: 4, kind: input, shape index: {}]   ;;  %s926_s5 = inlined_call_operand.vmem [shape: f32[256,32], index: 5, kind: input, shape index: {}]   ;;  %s927_s6 = inlined_call_operand.vmem [shape: f32[1,32], index: 6, kind: input, shape index: {}]   ;;  %s928_s7 = inlined_call_operand.hbm [shape: f32[1,32], index: 7, kind: output, shape index: {}]  }
   0x1   :  { %13 = vsyncpa [#allocation4], 0  ;;  %s648_s24 = smov [#allocation2]   ;;  %s600_s28 = scalar_lea.hbm %s924_s3, 8192 }
   0x2   :  { %s25_s25 = sshll.u32 %s648_s24, 4  ;;  %p601_p0 = scmp.ne.s32.totalorder %s924_s3, %s600_s28  ;;  %s26_s25 = int_to_ptr.vmem [resolvable:$true] %s25_s25 }
   0x3   :  { %p604_p1 = scmp.lt.u32.totalorder %s600_s28, %s924_s3 }
   0x5   :  { %p606_p2 = pnand %p604_p1, %p601_p0 }
   0x7   :  { %609 = shalt.err (!%p606_p2)
}
   0x8   :  { %s610_s10 = scalar_lea.vmem %s26_s25, 8192  ;;  %p615_p4 = scmp.lt.s32.totalorder %s26_s25, %s26_s25 }
   0x9   :  { %p611_p3 = scmp.ne.s32.totalorder %s26_s25, %s610_s10  ;;  %p616_p5 = scmp.lt.s32.totalorder %s610_s10, %s610_s10 }
   0xb   :  { %p617_p6 = por %p616_p5, %p615_p4 }
   0xd   :  { %p618_p7 = pnand %p617_p6, %p611_p3 }
   0xf   :  { %621 = shalt.err (!%p618_p7)
}
  0x10   :  { %s649_s11 = smov 256   ;;  %s650_s12 = smov 16  }
  0x11   :  { %31 = dma.hbm_to_vmem [thread:$0]  %s924_s3, 8192, %s26_s25, [#allocation3], %s649_s11, %s649_s11, %s650_s12  }
  0x12   :  { %644 = dma.done.wait [#allocation3], 8192  }
  0x13   :  { %645 = vsyncadd [#allocation3], 4294959104  ;;  %v651_v0 = vmov 0.0   ;;  %v43_v1 = vld [vmem:[%s922_s1 + $0x8] sm:$0xff]  ;;  %v45_v2 = vld [vmem:[%s922_s1 + $0x18] sm:$0xff]  ;;  %vm413_vm0 = vcmask 253952  }
  0x14   :  { %150 = vmatprep.mubr.f32.mxu0 %v651_v0  ;;  %v42_v3 = vld [vmem:[%s922_s1] sm:$0xff]  ;;  %v465_v4 = vpack.c.bf16 %v45_v2, %v43_v1  ;;  %v44_v5 = vld [vmem:[%s922_s1 + $0x10] sm:$0xff]  ;;  %v47_v6 = vld [vmem:[%s922_s1 + $0x28] sm:$0xff] }
  0x15   :  { %v49_v7 = vld [vmem:[%s922_s1 + $0x38] sm:$0xff]  ;;  %v467_v8 = vpack.c.bf16 %v44_v5, %v42_v3  ;;  %v46_v10 = vld [vmem:[%s922_s1 + $0x20] sm:$0xff]  ;;  %v48_v11 = vld [vmem:[%s922_s1 + $0x30] sm:$0xff] }
  0x16   :  { %v469_v9 = vpack.c.bf16 %v49_v7, %v47_v6  ;;  %v51_v12 = vld [vmem:[%s922_s1 + $0x48] sm:$0xff]  ;;  %466 = vmatprep.subr.bf16.mxu0 %v465_v4  ;;  %v53_v13 = vld [vmem:[%s922_s1 + $0x58] sm:$0xff]  ;;  %v471_v14 = vpack.c.bf16 %v48_v11, %v46_v10  ;;  %v50_v16 = vld [vmem:[%s922_s1 + $0x40] sm:$0xff] }
  0x17   :  { %468 = vmatpush1.bf16.msra.mxu0 %v467_v8  ;;  %v473_v15 = vpack.c.bf16 %v53_v13, %v51_v12  ;;  %v52_v17 = vld [vmem:[%s922_s1 + $0x50] sm:$0xff]  ;;  %v55_v18 = vld [vmem:[%s922_s1 + $0x68] sm:$0xff]  ;;  %v57_v19 = vld [vmem:[%s922_s1 + $0x78] sm:$0xff] }
  0x18   :  { %470 = vmatprep.subr.bf16.mxu0 %v469_v9  ;;  %v475_v20 = vpack.c.bf16 %v52_v17, %v50_v16  ;;  %v477_v21 = vpack.c.bf16 %v57_v19, %v55_v18  ;;  %v54_v22 = vld [vmem:[%s922_s1 + $0x60] sm:$0xff]  ;;  %v56_v23 = vld [vmem:[%s922_s1 + $0x70] sm:$0xff]  ;;  %v59_v24 = vld [vmem:[%s922_s1 + $0x88] sm:$0xff] }
  0x19   :  { %v61_v25 = vld [vmem:[%s922_s1 + $0x98] sm:$0xff]  ;;  %v58_v26 = vld [vmem:[%s922_s1 + $0x80] sm:$0xff]  ;;  %v60_v27 = vld [vmem:[%s922_s1 + $0x90] sm:$0xff]  ;;  %v479_v31 = vpack.c.bf16 %v56_v23, %v54_v22 }
  0x1a   :  { %v160_v28 = vld [vmem:[#allocation2 + $0x8] sm:$0xff]  ;;  %v162_v29 = vld [vmem:[#allocation2 + $0x18] sm:$0xff]  ;;  %v159_v30 = vld [vmem:[#allocation2] sm:$0xff]  ;;  %v481_v36 = vpack.c.bf16 %v61_v25, %v59_v24  ;;  %v483_v46 = vpack.c.bf16 %v60_v27, %v58_v26 }
  0x1b   :  { %472 = vmatpush1.bf16.msra.mxu0 %v471_v14  ;;  %v497_v32 = vpack.c.bf16 %v162_v29, %v160_v28  ;;  %v161_v33 = vld [vmem:[#allocation2 + $0x10] sm:$0xff]  ;;  %v164_v34 = vld [vmem:[#allocation2 + $0x28] sm:$0xff]  ;;  %v166_v35 = vld [vmem:[#allocation2 + $0x38] sm:$0xff] }
  0x1c   :  { %474 = vmatprep.subr.bf16.mxu0 %v473_v15  ;;  %v499_v37 = vpack.c.bf16 %v161_v33, %v159_v30  ;;  %v501_v38 = vpack.c.bf16 %v166_v35, %v164_v34  ;;  %v163_v39 = vld [vmem:[#allocation2 + $0x20] sm:$0xff]  ;;  %v165_v40 = vld [vmem:[#allocation2 + $0x30] sm:$0xff]  ;;  %v168_v41 = vld [vmem:[#allocation2 + $0x48] sm:$0xff] }
  0x1d   :  { %v63_v42 = vld [vmem:[%s922_s1 + $0xa8] sm:$0xff]  ;;  %v65_v43 = vld [vmem:[%s922_s1 + $0xb8] sm:$0xff]  ;;  %498 = vmatprep.subr.bf16.mxu1 %v497_v32  ;;  %v503_v45 = vpack.c.bf16 %v165_v40, %v163_v39  ;;  %v62_v47 = vld [vmem:[%s922_s1 + $0xa0] sm:$0xff] }
  0x1e   :  { %v170_v44 = vld [vmem:[#allocation2 + $0x58] sm:$0xff]  ;;  %500 = vmatpush1.bf16.msra.mxu1 %v499_v37  ;;  %v167_v49 = vld [vmem:[#allocation2 + $0x40] sm:$0xff]  ;;  %v169_v50 = vld [vmem:[#allocation2 + $0x50] sm:$0xff]  ;;  %v485_v51 = vpack.c.bf16 %v65_v43, %v63_v42 }
  0x1f   :  { %476 = vmatpush1.bf16.msra.mxu0 %v475_v20  ;;  %502 = vmatprep.subr.bf16.mxu1 %v501_v38  ;;  %v505_v48 = vpack.c.bf16 %v170_v44, %v168_v41  ;;  %v64_v52 = vld [vmem:[%s922_s1 + $0xb0] sm:$0xff]  ;;  %v172_v53 = vld [vmem:[#allocation2 + $0x68] sm:$0xff]  ;;  %v174_v54 = vld [vmem:[#allocation2 + $0x78] sm:$0xff]  ;;  %v507_v57 = vpack.c.bf16 %v169_v50, %v167_v49 }
  0x20   :  { %478 = vmatprep.subr.bf16.mxu0 %v477_v21  ;;  %v67_v55 = vld [vmem:[%s922_s1 + $0xc8] sm:$0xff]  ;;  %v69_v56 = vld [vmem:[%s922_s1 + $0xd8] sm:$0xff]  ;;  %v487_v58 = vpack.c.bf16 %v64_v52, %v62_v47  ;;  %v66_v59 = vld [vmem:[%s922_s1 + $0xc0] sm:$0xff]  ;;  %v509_v60 = vpack.c.bf16 %v174_v54, %v172_v53 }
  0x21   :  { %v171_v61 = vld [vmem:[#allocation2 + $0x60] sm:$0xff]  ;;  %v173_v62 = vld [vmem:[#allocation2 + $0x70] sm:$0xff]  ;;  %v489_v63 = vpack.c.bf16 %v69_v56, %v67_v55  ;;  %v176_v1 = vld [vmem:[#allocation2 + $0x88] sm:$0xff] }
  0x22   :  { %504 = vmatpush1.bf16.msra.mxu1 %v503_v45  ;;  %v68_v0 = vld [vmem:[%s922_s1 + $0xd0] sm:$0xff]  ;;  %v178_v2 = vld [vmem:[#allocation2 + $0x98] sm:$0xff]  ;;  %v71_v3 = vld [vmem:[%s922_s1 + $0xe8] sm:$0xff]  ;;  %v511_v5 = vpack.c.bf16 %v173_v62, %v171_v61 }
  0x23   :  { %480 = vmatpush1.bf16.msra.mxu0 %v479_v31  ;;  %506 = vmatprep.subr.bf16.mxu1 %v505_v48  ;;  %v73_v4 = vld [vmem:[%s922_s1 + $0xf8] sm:$0xff]  ;;  %v491_v6 = vpack.c.bf16 %v68_v0, %v66_v59  ;;  %v70_v7 = vld [vmem:[%s922_s1 + $0xe0] sm:$0xff]  ;;  %v513_v8 = vpack.c.bf16 %v178_v2, %v176_v1  ;;  %v177_v10 = vld [vmem:[#allocation2 + $0x90] sm:$0xff] }
  0x24   :  { %482 = vmatprep.subr.bf16.mxu0 %v481_v36  ;;  %v175_v9 = vld [vmem:[#allocation2 + $0x80] sm:$0xff]  ;;  %v493_v11 = vpack.c.bf16 %v73_v4, %v71_v3  ;;  %v72_v12 = vld [vmem:[%s922_s1 + $0xf0] sm:$0xff]  ;;  %v180_v13 = vld [vmem:[#allocation2 + $0xa8] sm:$0xff] }
  0x25   :  { %v182_v14 = vld [vmem:[#allocation2 + $0xb8] sm:$0xff]  ;;  %v515_v15 = vpack.c.bf16 %v177_v10, %v175_v9  ;;  %v495_v16 = vpack.c.bf16 %v72_v12, %v70_v7  ;;  %v179_v18 = vld [vmem:[#allocation2 + $0xa0] sm:$0xff]  ;;  %v181_v19 = vld [vmem:[#allocation2 + $0xb0] sm:$0xff] }
  0x26   :  { %508 = vmatpush1.bf16.msra.mxu1 %v507_v57  ;;  %v517_v17 = vpack.c.bf16 %v182_v14, %v180_v13  ;;  %v184_v20 = vld [vmem:[#allocation2 + $0xc8] sm:$0xff]  ;;  %v186_v21 = vld [vmem:[#allocation2 + $0xd8] sm:$0xff]  ;;  %v519_v22 = vpack.c.bf16 %v181_v19, %v179_v18  ;;  %v41_v23 = vld [vmem:[%s921_s0] sm:$0x1] }
  0x27   :  { %484 = vmatpush1.bf16.msra.mxu0 %v483_v46  ;;  %510 = vmatprep.subr.bf16.mxu1 %v509_v60  ;;  %v521_v24 = vpack.c.bf16 %v186_v21, %v184_v20  ;;  %v183_v25 = vld [vmem:[#allocation2 + $0xc0] sm:$0xff]  ;;  %v185_v26 = vld [vmem:[#allocation2 + $0xd0] sm:$0xff]  ;;  %v188_v27 = vld [vmem:[#allocation2 + $0xe8] sm:$0xff] }
  0x28   :  { %486 = vmatprep.subr.bf16.mxu0 %v485_v51  ;;  %v190_v28 = vld [vmem:[#allocation2 + $0xf8] sm:$0xff]  ;;  %v523_v29 = vpack.c.bf16 %v185_v26, %v183_v25  ;;  %v187_v31 = vld [vmem:[#allocation2 + $0xe0] sm:$0xff]  ;;  %v189_v32 = vld [vmem:[#allocation2 + $0xf0] sm:$0xff] }
  0x29   :  { %v525_v30 = vpack.c.bf16 %v190_v28, %v188_v27  ;;  %v192_v33 = vld [vmem:[#allocation2 + $0x108] sm:$0xff]  ;;  %v194_v34 = vld [vmem:[#allocation2 + $0x118] sm:$0xff]  ;;  %v527_v35 = vpack.c.bf16 %v189_v32, %v187_v31  ;;  %v191_v37 = vld [vmem:[#allocation2 + $0x100] sm:$0xff] }
  0x2a   :  { %512 = vmatpush1.bf16.msra.mxu1 %v511_v5  ;;  %v529_v36 = vpack.c.bf16 %v194_v34, %v192_v33  ;;  %v193_v38 = vld [vmem:[#allocation2 + $0x110] sm:$0xff]  ;;  %v196_v39 = vld [vmem:[#allocation2 + $0x128] sm:$0xff]  ;;  %v198_v40 = vld [vmem:[#allocation2 + $0x138] sm:$0xff] }
  0x2b   :  { %488 = vmatpush1.bf16.msra.mxu0 %v487_v58  ;;  %514 = vmatprep.subr.bf16.mxu1 %v513_v8  ;;  %v531_v41 = vpack.c.bf16 %v193_v38, %v191_v37  ;;  %v533_v42 = vpack.c.bf16 %v198_v40, %v196_v39  ;;  %v195_v43 = vld [vmem:[#allocation2 + $0x120] sm:$0xff]  ;;  %v197_v44 = vld [vmem:[#allocation2 + $0x130] sm:$0xff]  ;;  %v200_v45 = vld [vmem:[#allocation2 + $0x148] sm:$0xff] }
  0x2c   :  { %490 = vmatprep.subr.bf16.mxu0 %v489_v63  ;;  %v202_v46 = vld [vmem:[#allocation2 + $0x158] sm:$0xff]  ;;  %v535_v47 = vpack.c.bf16 %v197_v44, %v195_v43  ;;  %v199_v49 = vld [vmem:[#allocation2 + $0x140] sm:$0xff]  ;;  %v201_v50 = vld [vmem:[#allocation2 + $0x150] sm:$0xff] }
  0x2d   :  { %v537_v48 = vpack.c.bf16 %v202_v46, %v200_v45  ;;  %v204_v51 = vld [vmem:[#allocation2 + $0x168] sm:$0xff]  ;;  %v206_v52 = vld [vmem:[#allocation2 + $0x178] sm:$0xff]  ;;  %v539_v53 = vpack.c.bf16 %v201_v50, %v199_v49  ;;  %v203_v55 = vld [vmem:[#allocation2 + $0x160] sm:$0xff] }
  0x2e   :  { %516 = vmatpush1.bf16.msra.mxu1 %v515_v15  ;;  %v541_v54 = vpack.c.bf16 %v206_v52, %v204_v51  ;;  %v205_v56 = vld [vmem:[#allocation2 + $0x170] sm:$0xff]  ;;  %v208_v57 = vld [vmem:[#allocation2 + $0x188] sm:$0xff]  ;;  %v210_v58 = vld [vmem:[#allocation2 + $0x198] sm:$0xff] }
  0x2f   :  { %492 = vmatpush1.bf16.msra.mxu0 %v491_v6  ;;  %518 = vmatprep.subr.bf16.mxu1 %v517_v17  ;;  %v543_v59 = vpack.c.bf16 %v205_v56, %v203_v55  ;;  %v545_v60 = vpack.c.bf16 %v210_v58, %v208_v57  ;;  %v207_v61 = vld [vmem:[#allocation2 + $0x180] sm:$0xff]  ;;  %v209_v62 = vld [vmem:[#allocation2 + $0x190] sm:$0xff]  ;;  %v212_v63 = vld [vmem:[#allocation2 + $0x1a8] sm:$0xff]  ;;  %v76_v57 = vlaneseq }
  0x30   :  { %494 = vmatprep.subr.bf16.mxu0 %v493_v11  ;;  %v214_v0 = vld [vmem:[#allocation2 + $0x1b8] sm:$0xff]  ;;  %v547_v1 = vpack.c.bf16 %v209_v62, %v207_v61  ;;  %v211_v3 = vld [vmem:[#allocation2 + $0x1a0] sm:$0xff]  ;;  %v213_v4 = vld [vmem:[#allocation2 + $0x1b0] sm:$0xff] }
  0x31   :  { %v549_v2 = vpack.c.bf16 %v214_v0, %v212_v63  ;;  %v216_v5 = vld [vmem:[#allocation2 + $0x1c8] sm:$0xff]  ;;  %v218_v6 = vld [vmem:[#allocation2 + $0x1d8] sm:$0xff]  ;;  %v551_v7 = vpack.c.bf16 %v213_v4, %v211_v3  ;;  %v215_v9 = vld [vmem:[#allocation2 + $0x1c0] sm:$0xff]  ;;  %v77_v58 = vshrl.u32 %v76_v57, 7 }
  0x32   :  { %520 = vmatpush1.bf16.msra.mxu1 %v519_v22  ;;  %v553_v8 = vpack.c.bf16 %v218_v6, %v216_v5  ;;  %v217_v10 = vld [vmem:[#allocation2 + $0x1d0] sm:$0xff]  ;;  %v220_v12 = vld [vmem:[#allocation2 + $0x1e8] sm:$0xff]  ;;  %v222_v13 = vld [vmem:[#allocation2 + $0x1f8] sm:$0xff] }
  0x33   :  { %496 = vmatpush1.bf16.msra.mxu0 %v495_v16  ;;  %522 = vmatprep.subr.bf16.mxu1 %v521_v24  ;;  %v555_v11 = vpack.c.bf16 %v217_v10, %v215_v9  ;;  %v557_v14 = vpack.c.bf16 %v222_v13, %v220_v12  ;;  %v219_v15 = vld [vmem:[#allocation2 + $0x1e0] sm:$0xff]  ;;  %v221_v16 = vld [vmem:[#allocation2 + $0x1f0] sm:$0xff]  ;;  %v325_v19 = vld [vmem:[%s926_s5 + $0x88] sm:$0xff]  ;;  %v82_v61 = vsub.s32 1, %v77_v58 }
  0x34   :  { %v559_v17 = vpack.c.bf16 %v221_v16, %v219_v15  ;;  %v324_v18 = vld [vmem:[%s926_s5 + $0x80] sm:$0xff]  ;;  %v309_v22 = vld [vmem:[%s926_s5 + $0x8] sm:$0xff]  ;;  %v327_v24 = vld [vmem:[%s926_s5 + $0x98] sm:$0xff] }
  0x35   :  { %v308_v20 = vld [vmem:[%s926_s5] sm:$0xff]  ;;  %v561_v21 = vpack.c.bf16 %v325_v19, %v324_v18  ;;  %v310_v27 = vld [vmem:[%s926_s5 + $0x10] sm:$0xff]  ;;  %v311_v28 = vld [vmem:[%s926_s5 + $0x18] sm:$0xff] }
  0x36   :  { %151 = vmatmul.mubr.f32.vlgmr.msra.gmra.mrb[0].mxu0 %v41_v23  ;;  %524 = vmatpush1.bf16.msra.mxu1 %v523_v29  ;;  %v326_v23 = vld [vmem:[%s926_s5 + $0x90] sm:$0xff]  ;;  %v563_v25 = vpack.c.bf16 %v309_v22, %v308_v20  ;;  %v328_v29 = vld [vmem:[%s926_s5 + $0xa0] sm:$0xff]  ;;  %v567_v31 = vpack.c.bf16 %v311_v28, %v310_v27  ;;  %v313_v34 = vld [vmem:[%s926_s5 + $0x28] sm:$0xff] }
  0x37   :  { %526 = vmatprep.subr.bf16.mxu1 %v525_v30  ;;  %v565_v26 = vpack.c.bf16 %v327_v24, %v326_v23  ;;  %562 = vmatprep.subr.bf16.mxu0 %v561_v21  ;;  %v329_v30 = vld [vmem:[%s926_s5 + $0xa8] sm:$0xff]  ;;  %v312_v33 = vld [vmem:[%s926_s5 + $0x20] sm:$0xff]  ;;  %v314_v39 = vld [vmem:[%s926_s5 + $0x30] sm:$0xff] }
  0x38   :  { %564 = vmatpush3.bf16.msra.mxu0 %v563_v25  ;;  %v569_v32 = vpack.c.bf16 %v329_v30, %v328_v29  ;;  %v571_v37 = vpack.c.bf16 %v313_v34, %v312_v33  ;;  %v315_v40 = vld [vmem:[%s926_s5 + $0x38] sm:$0xff]  ;;  %v316_v45 = vld [vmem:[%s926_s5 + $0x40] sm:$0xff]  ;;  %v317_v46 = vld [vmem:[%s926_s5 + $0x48] sm:$0xff] }
  0x39   :  { %566 = vmatprep.subr.bf16.mxu0 %v565_v26  ;;  %v575_v43 = vpack.c.bf16 %v315_v40, %v314_v39  ;;  %v579_v49 = vpack.c.bf16 %v317_v46, %v316_v45  ;;  %v318_v51 = vld [vmem:[%s926_s5 + $0x50] sm:$0xff]  ;;  %v319_v52 = vld [vmem:[%s926_s5 + $0x58] sm:$0xff]  ;;  %v320_v6 = vld [vmem:[%s926_s5 + $0x60] sm:$0xff] }
  0x3a   :  { %528 = vmatpush1.bf16.msra.mxu1 %v527_v35  ;;  %v330_v35 = vld [vmem:[%s926_s5 + $0xb0] sm:$0xff]  ;;  %v583_v55 = vpack.c.bf16 %v319_v52, %v318_v51  ;;  %v339_v10 = vld [vmem:[%s926_s5 + $0xf8] sm:$0xff]  ;;  %v223_v15 = vld [vmem:[%s925_s4] sm:$0x3]  ;;  %s652_s4 = smov [#allocation5]  }
  0x3b   :  { %530 = vmatprep.subr.bf16.mxu1 %v529_v36  ;;  %v331_v36 = vld [vmem:[%s926_s5 + $0xb8] sm:$0xff]  ;;  %v338_v9 = vld [vmem:[%s926_s5 + $0xf0] sm:$0xff]  ;;  %v340_v25 = vld [vmem:[%s927_s6] sm:$0x1]  ;;  %s421_s3 = sshll.u32 %s652_s4, 4  ;;  %s422_s3 = int_to_ptr.vmem [resolvable:$true] %s421_s3 }
  0x3c   :  { %568 = vmatpush3.bf16.msra.mxu0 %v567_v31  ;;  %v573_v38 = vpack.c.bf16 %v331_v36, %v330_v35  ;;  %v322_v12 = vld [vmem:[%s926_s5 + $0x70] sm:$0xff]  ;;  %v323_v13 = vld [vmem:[%s926_s5 + $0x78] sm:$0xff]  ;;  %s622_s23 = scalar_lea.vmem %s422_s3, 16  ;;  %s626_s24 = scalar_lea.vmem %s422_s3, 32 }
  0x3d   :  { %570 = vmatprep.subr.bf16.mxu0 %v569_v32  ;;  %p623_p8 = scmp.ne.s32.totalorder %s422_s3, %s622_s23  ;;  %p627_p9 = scmp.lt.s32.totalorder %s422_s3, %s422_s3 }
  0x3e   :  { %532 = vmatpush1.bf16.msra.mxu1 %v531_v41  ;;  %v332_v41 = vld [vmem:[%s926_s5 + $0xc0] sm:$0xff]  ;;  %p628_p10 = scmp.lt.s32.totalorder %s626_s24, %s622_s23 }
  0x3f   :  { %534 = vmatprep.subr.bf16.mxu1 %v533_v42  ;;  %v333_v42 = vld [vmem:[%s926_s5 + $0xc8] sm:$0xff] }
  0x40   :  { %572 = vmatpush3.bf16.msra.mxu0 %v571_v37  ;;  %v577_v44 = vpack.c.bf16 %v333_v42, %v332_v41  ;;  %p629_p11 = por %p628_p10, %p627_p9 }
  0x41   :  { %574 = vmatprep.subr.bf16.mxu0 %v573_v38 }
  0x42   :  { %536 = vmatpush1.bf16.msra.mxu1 %v535_v47  ;;  %v334_v47 = vld [vmem:[%s926_s5 + $0xd0] sm:$0xff]  ;;  %p630_p12 = pnand %p629_p11, %p623_p8 }
  0x43   :  { %538 = vmatprep.subr.bf16.mxu1 %v537_v48  ;;  %v335_v48 = vld [vmem:[%s926_s5 + $0xd8] sm:$0xff] }
  0x44   :  { %576 = vmatpush3.bf16.msra.mxu0 %v575_v43  ;;  %v581_v50 = vpack.c.bf16 %v335_v48, %v334_v47 }
  0x45   :  { %578 = vmatprep.subr.bf16.mxu0 %v577_v44 }
  0x46   :  { %540 = vmatpush1.bf16.msra.mxu1 %v539_v53  ;;  %v336_v53 = vld [vmem:[%s926_s5 + $0xe0] sm:$0xff] }
  0x47   :  { %542 = vmatprep.subr.bf16.mxu1 %v541_v54  ;;  %v337_v54 = vld [vmem:[%s926_s5 + $0xe8] sm:$0xff] }
  0x48   :  { %580 = vmatpush3.bf16.msra.mxu0 %v579_v49  ;;  %v585_v56 = vpack.c.bf16 %v337_v54, %v336_v53 }
  0x49   :  { %582 = vmatprep.subr.bf16.mxu0 %v581_v50 }
  0x4a   :  { %544 = vmatpush1.bf16.msra.mxu1 %v543_v59  ;;  %v78_v59 = vsub.s32 0, %v77_v58 }
  0x4b   :  { %546 = vmatprep.subr.bf16.mxu1 %v545_v60  ;;  %v74_v60 = vld [vmem:[%s923_s2] sm:$0x3] }
  0x4c   :  { %584 = vmatpush3.bf16.msra.mxu0 %v583_v55  ;;  %v79_v62 = vrot.slane %v74_v60, %v78_v59  ;;  %v83_v63 = vrot.slane %v74_v60, %v82_v61  ;;  %v228_v16 = vrot.slane %v223_v15, %v78_v59 }
  0x4d   :  { %586 = vmatprep.subr.bf16.mxu0 %v585_v56 }
  0x4e   :  { %548 = vmatpush1.bf16.msra.mxu1 %v547_v1 }
  0x4f   :  { %550 = vmatprep.subr.bf16.mxu1 %v549_v2 }
  0x52   :  { %552 = vmatpush1.bf16.msra.mxu1 %v551_v7  ;;  %v321_v7 = vld [vmem:[%s926_s5 + $0x68] sm:$0xff] }
  0x53   :  { %554 = vmatprep.subr.bf16.mxu1 %v553_v8  ;;  %v587_v8 = vpack.c.bf16 %v321_v7, %v320_v6 }
  0x55   :  { %588 = vmatpush3.bf16.msra.mxu0 %v587_v8 }
  0x56   :  { %556 = vmatpush1.bf16.msra.mxu1 %v555_v11  ;;  %v589_v11 = vpack.c.bf16 %v339_v10, %v338_v9 }
  0x57   :  { %558 = vmatprep.subr.bf16.mxu1 %v557_v14  ;;  %v591_v14 = vpack.c.bf16 %v323_v13, %v322_v12 }
  0x58   :  { %590 = vmatprep.subr.bf16.mxu0 %v589_v11 }
  0x59   :  { %592 = vmatpush3.bf16.msra.mxu0 %v591_v14 }
  0x5a   :  { %560 = vmatpush1.bf16.msra.mxu1 %v559_v17  ;;  %v232_v17 = vrot.slane %v223_v15, %v82_v61 }
 0x109   :  { %v152_v0 = vpop.f32.mrb[0].mxu0 }
 0x10a   :  { %v153_v1 = vadd.f32 %v152_v0, %v79_v62  ;;  %v154_v2 = vpop.f32.mrb[1].mxu0 }
 0x10b   :  { %v155_v3 = vadd.f32 %v154_v2, %v83_v63 }
 0x10c   :  { %v157_v5 = vmax.f32 %v153_v1, 0.0 }
 0x10d   :  { %v158_v4 = vmax.f32 %v155_v3, 0.0 }
 0x10f   :  { %299 = vmatprep.mubr.f32.mxu1 %v158_v4 }
 0x110   :  { %300 = vmatmul.mubr.f32.vlgmr.msra.gmra.mrb[0].mxu1 %v157_v5 }
 0x1e3   :  { %v301_v18 = vpop.f32.mrb[0].mxu1 }
 0x1e4   :  { %v302_v19 = vadd.f32 %v301_v18, %v228_v16  ;;  %v303_v20 = vpop.f32.mrb[1].mxu1 }
 0x1e5   :  { %v304_v21 = vadd.f32 %v303_v20, %v232_v17 }
 0x1e6   :  { %v306_v23 = vmax.f32 %v302_v19, 0.0 }
 0x1e7   :  { %v307_v22 = vmax.f32 %v304_v21, 0.0 }
 0x1e9   :  { %405 = vmatprep.mubr.f32.mxu0 %v307_v22 }
 0x1ea   :  { %406 = vmatmul.mubr.f32.vlgmr.msra.gmra.mrb[2].mxu0 %v306_v23 }
 0x2bd   :  { %v462_v24 = vpop.f32.mrb[2].mxu0 }
 0x2be   :  { %v463_v26 = vpop.f32.mrb[3].mxu0 }
 0x2bf   :  { %v464_v27 = vadd.f32 %v463_v26, %v462_v24 }
 0x2c1   :  { %v408_v28 = vadd.f32 %v464_v27, %v340_v25 }
 0x2c3   :  { %598 = vtanh.f32 %v408_v28 }
 0x2cd   :  { %v599_v29 = vpop.eup %598 }
 0x2ce   :  { %v412_v30 = vmul.f32 100.0, %v599_v29 }
 0x2d0   :  { %414 = vst.msk [vmem:[#allocation5] sm:$0x1] %vm413_vm0, %v412_v30 }
 0x2d1   :  { %633 = shalt.err (!%p630_p12)
}
 0x2d2   :  { %s634_s26 = scalar_lea.hbm %s928_s7, 16 }
 0x2d3   :  { %p635_p13 = scmp.ne.s32.totalorder %s928_s7, %s634_s26  ;;  %p638_p0 = scmp.lt.u32.totalorder %s634_s26, %s928_s7 }
 0x2d5   :  { %p640_p1 = pnand %p638_p0, %p635_p13 }
 0x2d7   :  { %643 = shalt.err (!%p640_p1)
}
 0x2d8   :  { %424 = dma.vmem_to_hbm [thread:$0]  %s422_s3, 16, %s928_s7, [#allocation4]  }
 0x2d9   :  { %646 = dma.done.wait [#allocation4], 16  }
 0x2da   :  { %647 = vsyncadd [#allocation4], 4294967280 }
 0x2db   :  { %428 = vsyncpa [#allocation3], 1 }
 0x2dc   :  { %429 = vsyncpa [#allocation4], 1 }

</bundles_post_ra>
